<compile_context>
chip_gen: v5e
topology: v5e:2x2
jax: 0.10.0
libtpu: 0.0.40
codegen_flags: <defaults>
</compile_context>

<pallas_src>
import jax
import jax.numpy as jnp
from jax.experimental import pallas as pl
from jax.experimental.pallas import tpu as pltpu


def _round_up(n, m):
    return ((n + m - 1) // m) * m


# ------------------------------------------------------------------ kernel --

def _lstm_seq_kernel(x_ref, state_ref, w_ih0_ref, w_ihr_ref, w_hh_ref, b_ref,
                     w_out_ref, b_out_ref,
                     out_ref, state_out_ref,
                     state_sc):
    """One grid step = one timestep through all L LSTM layers + Linear+sigmoid.

    x_ref         : (1, BP, F_in)   timestep t input (only pipelined operand)
    state_ref     : (2, L, BP, H)   initial [h; c]      (resident, read at t=0)
    w_ih0_ref     : (F_in, 4H)      layer-0 W_ih^T      (resident)
    w_ihr_ref     : (L-1, H, 4H)    layers>=1 W_ih^T    (resident)
    w_hh_ref      : (L, H, 4H)      W_hh^T              (resident)
    b_ref         : (L, 1, 4H)      b_ih + b_hh         (resident)
    w_out_ref     : (H, 128)        output Linear W^T, lane-padded (resident)
    b_out_ref     : (1, 128)        output Linear bias, lane-padded (resident)
    out_ref       : (1, BP, 128)    timestep t output (lane-dense store)
    state_out_ref : (2, L, BP, H)   final [h; c], written once at t = T-1
    state_sc      : (2, L, BP, H)   VMEM scratch carrying h/c across steps
    """
    t = pl.program_id(0)
    num_layers, hidden = w_hh_ref.shape[0], w_hh_ref.shape[1]

    # Load the initial h/c into the persistent VMEM scratch once.
    @pl.when(t == 0)
    def _():
        state_sc[...] = state_ref[...]

    layer_in = x_ref[0]                                      # (BP, F_in)
    for layer in range(num_layers):                          # static unroll
        h_prev = state_sc[0, layer]                          # (BP, H)
        c_prev = state_sc[1, layer]
        w_x = w_ih0_ref[...] if layer == 0 else w_ihr_ref[layer - 1]

        # Two MXU passes summed — no lane-dim concat on the critical path.
        gates = (jnp.dot(layer_in, w_x, preferred_element_type=jnp.float32)
                 + jnp.dot(h_prev, w_hh_ref[layer],
                           preferred_element_type=jnp.float32)
                 + b_ref[layer])                             # (BP, 4H)

        # Full-vreg EUP passes; slice the (i, f, g, o) gates afterwards.
        sig = jax.nn.sigmoid(gates)
        tnh = jnp.tanh(gates)
        i_g = sig[:, 0 * hidden:1 * hidden]
        f_g = sig[:, 1 * hidden:2 * hidden]
        g_g = tnh[:, 2 * hidden:3 * hidden]
        o_g = sig[:, 3 * hidden:4 * hidden]

        c_new = f_g * c_prev + i_g * g_g
        h_new = o_g * jnp.tanh(c_new)

        state_sc[0, layer] = h_new
        state_sc[1, layer] = c_new
        layer_in = h_new                                     # feed next layer

    # Lane-dense (BP, 128) store of sigmoid(Linear(h_top)) each step.
    out_ref[0] = jax.nn.sigmoid(
        jnp.dot(layer_in, w_out_ref[...], preferred_element_type=jnp.float32)
        + b_out_ref[...])

    # Final h/c written once, as a single stacked slab, at the last step.
    @pl.when(t == pl.num_programs(0) - 1)
    def _():
        state_out_ref[...] = state_sc[...]


# ----------------------------------------------------------------- wrapper --

@jax.jit
def _fused_sequence(x_seq, state, w_ih0_t, w_ihr_t, w_hh_t, b_cat,
                    w_out_t, b_out):
    """Run the whole (T, BP, F_in) sequence in one pallas_call."""
    seq_len, bp, f_in = x_seq.shape
    _, num_layers, _, hidden = state.shape
    out_pad = w_out_t.shape[1]
    four_h = 4 * hidden

    grid_spec = pltpu.PrefetchScalarGridSpec(
        num_scalar_prefetch=0,
        grid=(seq_len,),
        in_specs=[
            # x: streamed one timestep per grid step (only pipelined input).
            pl.BlockSpec((1, bp, f_in), lambda t: (t, 0, 0)),
            # state + all weights: constant block index -> DMA'd once, resident.
            pl.BlockSpec((2, num_layers, bp, hidden), lambda t: (0, 0, 0, 0)),
            pl.BlockSpec((f_in, four_h), lambda t: (0, 0)),
            pl.BlockSpec(w_ihr_t.shape, lambda t: (0, 0, 0)),
            pl.BlockSpec((num_layers, hidden, four_h), lambda t: (0, 0, 0)),
            pl.BlockSpec((num_layers, 1, four_h), lambda t: (0, 0, 0)),
            pl.BlockSpec((hidden, out_pad), lambda t: (0, 0)),
            pl.BlockSpec((1, out_pad), lambda t: (0, 0)),
        ],
        out_specs=(
            pl.BlockSpec((1, bp, out_pad), lambda t: (t, 0, 0)),
            pl.BlockSpec((2, num_layers, bp, hidden), lambda t: (0, 0, 0, 0)),
        ),
        scratch_shapes=[pltpu.VMEM((2, num_layers, bp, hidden), jnp.float32)],
    )

    return pl.pallas_call(
        _lstm_seq_kernel,
        grid_spec=grid_spec,
        out_shape=(jax.ShapeDtypeStruct((seq_len, bp, out_pad), jnp.float32),
                   jax.ShapeDtypeStruct((2, num_layers, bp, hidden),
                                        jnp.float32)),
        # state input (arg 1) aliases the state output (output 1).
        input_output_aliases={1: 1},
        compiler_params=pltpu.CompilerParams(
            dimension_semantics=("arbitrary",)),   # sequential recurrence in T
    )(x_seq, state, w_ih0_t, w_ihr_t, w_hh_t, b_cat, w_out_t, b_out)


# ------------------------------------------------------------------ module --

class LSTMCopy:
    """JAX/Pallas port of the PyTorch LSTMCopy module (forward pass only)."""

    def __init__(self, input_size=9, hidden_size=32, output_size=8,
                 num_layer=3, batch_size=1, key=None):
        self.input_size = input_size
        self.hidden_size = hidden_size
        self.output_size = output_size
        self.num_layer = num_layer
        self.batch_size = batch_size

        if key is None:
            key = jax.random.PRNGKey(0)

        # Deterministic init, same distribution family as torch.nn.LSTM:
        # U(-1/sqrt(H), 1/sqrt(H)) for every parameter tensor.
        bound = 1.0 / float(hidden_size) ** 0.5
        w_ih_t, w_hh_t, b_cat, ref_layers = [], [], [], []
        for layer in range(num_layer):
            d_in = input_size if layer == 0 else hidden_size
            key, k0, k1, k2, k3 = jax.random.split(key, 5)
            w_ih = jax.random.uniform(k0, (4 * hidden_size, d_in),
                                      jnp.float32, -bound, bound)
            w_hh = jax.random.uniform(k1, (4 * hidden_size, hidden_size),
                                      jnp.float32, -bound, bound)
            b_ih = jax.random.uniform(k2, (4 * hidden_size,),
                                      jnp.float32, -bound, bound)
            b_hh = jax.random.uniform(k3, (4 * hidden_size,),
                                      jnp.float32, -bound, bound)
            w_ih_t.append(w_ih.T)                    # (d_in, 4H)
            w_hh_t.append(w_hh.T)                    # (H, 4H)
            b_cat.append((b_ih + b_hh).reshape(1, 4 * hidden_size))
            ref_layers.append(dict(w_ih=w_ih, w_hh=w_hh, b_ih=b_ih, b_hh=b_hh))

        self.w_ih0_t = w_ih_t[0]                     # (F_in, 4H)
        if num_layer > 1:
            self.w_ihr_t = jnp.stack(w_ih_t[1:], axis=0)   # (L-1, H, 4H)
        else:                                        # dummy, never read
            self.w_ihr_t = jnp.zeros((1, hidden_size, 4 * hidden_size),
                                     jnp.float32)
        self.w_hh_t = jnp.stack(w_hh_t, axis=0)      # (L, H, 4H)
        self.b_cat = jnp.stack(b_cat, axis=0)        # (L, 1, 4H)
        self._ref_layers = ref_layers                # for the pure-JAX reference

        key, k0, k1 = jax.random.split(key, 3)
        w_out = jax.random.uniform(k0, (output_size, hidden_size),
                                   jnp.float32, -bound, bound)
        b_out = jax.random.uniform(k1, (output_size,),
                                   jnp.float32, -bound, bound)
        # Lane-dense output: pad O -> 128 lanes (sliced back in the wrapper).
        out_pad = _round_up(max(output_size, 128), 128)
        self.w_out_t = jnp.zeros((hidden_size, out_pad),
                                 jnp.float32).at[:, :output_size].set(w_out.T)
        self.b_out = jnp.zeros((1, out_pad),
                               jnp.float32).at[0, :output_size].set(b_out)
        self._ref_out = (w_out, b_out)

        self._bp = _round_up(max(batch_size, 8), 8)  # full-sublane batch
        self._state = None                           # padded (2, L, BP, H)

    # -- state handling -----------------------------------------------------

    def init_sequence(self, batch_size):
        """Initializing the state (matches the PyTorch module)."""
        self.batch_size = batch_size
        self._bp = _round_up(max(batch_size, 8), 8)
        self._state = jnp.zeros(
            (2, self.num_layer, self._bp, self.hidden_size), jnp.float32)

    @property
    def hidden_state(self):
        # API-compatible unpadded view; the recurrence itself always feeds the
        # padded self._state straight back into the kernel (no pad/slice loop).
        b = self.batch_size
        return (self._state[0, :, :b, :], self._state[1, :, :b, :])

    # -- forward ------------------------------------------------------------

    def _run(self, x_seq_padded):
        return _fused_sequence(x_seq_padded, self._state, self.w_ih0_t,
                               self.w_ihr_t, self.w_hh_t, self.b_cat,
                               self.w_out_t, self.b_out)

    def forward(self, x=None):
        """Single timestep (PyTorch-equivalent forward)."""
        b, bp = self.batch_size, self._bp
        x_p = jnp.zeros((1, bp, self.input_size), jnp.float32)
        if x is not None:
            x_p = x_p.at[0, :b, :].set(x)
        out_seq, self._state = self._run(x_p)
        out = out_seq[0, :b, :self.output_size]
        # torch: lstm output (1, B, H) -> Linear -> sigmoid -> unsqueeze(0)
        return out[None, None, :, :], self.hidden_state

    def forward_sequence(self, x_seq):
        """Run T steps in ONE pallas_call (amortized launch + weight DMA)."""
        t, b = x_seq.shape[0], self.batch_size
        x_p = jnp.zeros((t, self._bp, self.input_size),
                        jnp.float32).at[:, :b, :].set(x_seq)
        out_seq, self._state = self._run(x_p)
        return out_seq[:, :b, :self.output_size], self.hidden_state

    def calculate_num_params(self):
        """Returns the total number of parameters."""
        n = 0
        for p in self._ref_layers:
            for v in p.values():
                n += v.size
        w_out, b_out = self._ref_out
        return n + w_out.size + b_out.size


# ----------------------------------------------------------- pure-JAX ref ---

def _reference_step(model, x, h0, c0):
    """Plain-JAX single LSTM step using the raw (untransposed) weights."""
    hidden = model.hidden_size
    h_list, c_list = [], []
    layer_in = x
    for layer, p in enumerate(model._ref_layers):
        gates = (layer_in @ p["w_ih"].T + h0[layer] @ p["w_hh"].T
                 + p["b_ih"] + p["b_hh"])
        i_g = jax.nn.sigmoid(gates[:, 0 * hidden:1 * hidden])
        f_g = jax.nn.sigmoid(gates[:, 1 * hidden:2 * hidden])
        g_g = jnp.tanh(gates[:, 2 * hidden:3 * hidden])
        o_g = jax.nn.sigmoid(gates[:, 3 * hidden:4 * hidden])
        c_new = f_g * c0[layer] + i_g * g_g
        h_new = o_g * jnp.tanh(c_new)
        h_list.append(h_new)
        c_list.append(c_new)
        layer_in = h_new
    w_out, b_out = model._ref_out
    out = jax.nn.sigmoid(layer_in @ w_out.T + b_out)
    return out, jnp.stack(h_list), jnp.stack(c_list)


# -------------------------------------------------------------------- main --

if __name__ == "__main__":
    key = jax.random.PRNGKey(0)
    k_params, k_x1, k_xs = jax.random.split(key, 3)

    batch_size = 2
    input_size = 9
    hidden_size = 32
    output_size = 8
    num_layer = 3
    seq_len = 8

    model = LSTMCopy(input_size=input_size, hidden_size=hidden_size,
                     output_size=output_size, num_layer=num_layer,
                     batch_size=batch_size, key=k_params)

    # ---- single-timestep forward (matches the PyTorch module) -------------
    model.init_sequence(batch_size)
    x1 = jax.random.normal(k_x1, (batch_size, input_size), jnp.float32)
    h0, c0 = model.hidden_state

    out, (h, c) = model.forward(x1)
    jax.block_until_ready(out)
    jax.block_until_ready(h)
    jax.block_until_ready(c)

    assert out.shape == (1, 1, batch_size, output_size)
    assert h.shape == (num_layer, batch_size, hidden_size)
    assert c.shape == (num_layer, batch_size, hidden_size)

    ref_out, ref_h, ref_c = _reference_step(model, x1, h0, c0)
    assert float(jnp.max(jnp.abs(out[0, 0] - ref_out))) < 1e-3
    assert float(jnp.max(jnp.abs(h - ref_h))) < 1e-3
    assert float(jnp.max(jnp.abs(c - ref_c))) < 1e-3

    # ---- T-step sequence: one pallas_call, state carried in VMEM ----------
    model.init_sequence(batch_size)
    x_seq = jax.random.normal(k_xs, (seq_len, batch_size, input_size),
                              jnp.float32)
    out_seq, (h_t, c_t) = model.forward_sequence(x_seq)
    jax.block_until_ready(out_seq)
    assert out_seq.shape == (seq_len, batch_size, output_size)

    rh = jnp.zeros((num_layer, batch_size, hidden_size), jnp.float32)
    rc = jnp.zeros_like(rh)
    ref_outs = []
    for t in range(seq_len):
        o, rh, rc = _reference_step(model, x_seq[t], rh, rc)
        ref_outs.append(o)
    ref_out_seq = jnp.stack(ref_outs, axis=0)
    assert float(jnp.max(jnp.abs(out_seq - ref_out_seq))) < 1e-3
    assert float(jnp.max(jnp.abs(h_t - rh))) < 1e-3
    assert float(jnp.max(jnp.abs(c_t - rc))) < 1e-3

    print("KERNEL_OK")
</pallas_src>

<mosaic_0001>
module attributes {stable_mosaic.version = 11 : i64} {
  func.func @_lstm_seq_kernel(%arg0: i32, %arg1: memref<1x8x9xf32, #tpu.memory_space<vmem>>, %arg2: memref<2x3x8x32xf32, #tpu.memory_space<vmem>>, %arg3: memref<9x128xf32, #tpu.memory_space<vmem>>, %arg4: memref<2x32x128xf32, #tpu.memory_space<vmem>>, %arg5: memref<3x32x128xf32, #tpu.memory_space<vmem>>, %arg6: memref<3x1x128xf32, #tpu.memory_space<vmem>>, %arg7: memref<32x128xf32, #tpu.memory_space<vmem>>, %arg8: memref<1x128xf32, #tpu.memory_space<vmem>>, %arg9: memref<1x8x128xf32, #tpu.memory_space<vmem>>, %arg10: memref<2x3x8x32xf32, #tpu.memory_space<vmem>>, %arg11: memref<2x3x8x32xf32, #tpu.memory_space<vmem>>) attributes {dimension_semantics = [#tpu.dimension_semantics<arbitrary>], iteration_bounds = array<i64: 1>, scalar_prefetch = 0 : i64, scratch_operands = 1 : i64, tpu.core_type = #tpu.core_type<tc>, window_params = [{transform_indices = @transform_0, window_bounds = array<i64: 1, 8, 9>}, {pipeline_mode = #tpu.pipeline_mode<synchronous>, transform_indices = @transform_1, window_bounds = array<i64: 2, 3, 8, 32>}, {pipeline_mode = #tpu.pipeline_mode<synchronous>, transform_indices = @transform_2, window_bounds = array<i64: 9, 128>}, {pipeline_mode = #tpu.pipeline_mode<synchronous>, transform_indices = @transform_3, window_bounds = array<i64: 2, 32, 128>}, {pipeline_mode = #tpu.pipeline_mode<synchronous>, transform_indices = @transform_4, window_bounds = array<i64: 3, 32, 128>}, {pipeline_mode = #tpu.pipeline_mode<synchronous>, transform_indices = @transform_5, window_bounds = array<i64: 3, 1, 128>}, {pipeline_mode = #tpu.pipeline_mode<synchronous>, transform_indices = @transform_6, window_bounds = array<i64: 32, 128>}, {pipeline_mode = #tpu.pipeline_mode<synchronous>, transform_indices = @transform_7, window_bounds = array<i64: 1, 128>}, {transform_indices = @transform_8, window_bounds = array<i64: 1, 8, 128>}, {pipeline_mode = #tpu.pipeline_mode<synchronous>, transform_indices = @transform_9, window_bounds = array<i64: 2, 3, 8, 32>}]} {
    %c0_i32 = arith.constant 0 : i32
    %0 = arith.cmpi eq, %arg0, %c0_i32 : i32
    %1 = arith.extui %0 : i1 to i32
    %c0_i32_0 = arith.constant 0 : i32
    %2 = arith.cmpi ne, %1, %c0_i32_0 : i32
    scf.if %2 {
      %c0_94 = arith.constant 0 : index
      %c0_95 = arith.constant 0 : index
      %c0_96 = arith.constant 0 : index
      %c0_97 = arith.constant 0 : index
      %128 = vector.load %arg2[%c0_94, %c0_95, %c0_96, %c0_97] : memref<2x3x8x32xf32, #tpu.memory_space<vmem>>, vector<2x3x8x32xf32>
      %c0_98 = arith.constant 0 : index
      %c0_99 = arith.constant 0 : index
      %c0_100 = arith.constant 0 : index
      %c0_101 = arith.constant 0 : index
      %129 = vector.load %arg11[%c0_98, %c0_99, %c0_100, %c0_101] : memref<2x3x8x32xf32, #tpu.memory_space<vmem>>, vector<2x3x8x32xf32>
      tpu.vector_store %arg11[%c0_98, %c0_99, %c0_100, %c0_101], %128 {strides = array<i32>} : memref<2x3x8x32xf32, #tpu.memory_space<vmem>>, vector<2x3x8x32xf32>,
    } else {
    }
    %c0 = arith.constant 0 : index
    %c0_1 = arith.constant 0 : index
    %c0_2 = arith.constant 0 : index
    %3 = vector.load %arg1[%c0, %c0_1, %c0_2] : memref<1x8x9xf32, #tpu.memory_space<vmem>>, vector<1x8x9xf32>
    %4 = vector.shape_cast %3 : vector<1x8x9xf32> to vector<8x9xf32>
    %c0_3 = arith.constant 0 : index
    %c0_4 = arith.constant 0 : index
    %c0_5 = arith.constant 0 : index
    %c0_6 = arith.constant 0 : index
    %5 = vector.load %arg11[%c0_3, %c0_4, %c0_5, %c0_6] : memref<2x3x8x32xf32, #tpu.memory_space<vmem>>, vector<1x1x8x32xf32>
    %6 = vector.shape_cast %5 : vector<1x1x8x32xf32> to vector<8x32xf32>
    %c1 = arith.constant 1 : index
    %c0_7 = arith.constant 0 : index
    %c0_8 = arith.constant 0 : index
    %c0_9 = arith.constant 0 : index
    %7 = vector.load %arg11[%c1, %c0_7, %c0_8, %c0_9] : memref<2x3x8x32xf32, #tpu.memory_space<vmem>>, vector<1x1x8x32xf32>
    %8 = vector.shape_cast %7 : vector<1x1x8x32xf32> to vector<8x32xf32>
    %c0_10 = arith.constant 0 : index
    %c0_11 = arith.constant 0 : index
    %9 = vector.load %arg3[%c0_10, %c0_11] : memref<9x128xf32, #tpu.memory_space<vmem>>, vector<9x128xf32>
    %cst = arith.constant dense<0.000000e+00> : vector<8x128xf32>
    %10 = tpu.matmul %4, %9, %cst {dimension_numbers = #tpu.dot_dimension_numbers<[1], [0], [0], [1], [0, 0, 1, 1], [], []>} : vector<8x9xf32>, vector<9x128xf32>, vector<8x128xf32> -> vector<8x128xf32>
    %c0_12 = arith.constant 0 : index
    %c0_13 = arith.constant 0 : index
    %c0_14 = arith.constant 0 : index
    %11 = vector.load %arg5[%c0_12, %c0_13, %c0_14] : memref<3x32x128xf32, #tpu.memory_space<vmem>>, vector<1x32x128xf32>
    %12 = vector.shape_cast %11 : vector<1x32x128xf32> to vector<32x128xf32>
    %cst_15 = arith.constant dense<0.000000e+00> : vector<8x128xf32>
    %13 = tpu.matmul %6, %12, %cst_15 {dimension_numbers = #tpu.dot_dimension_numbers<[1], [0], [0], [1], [0, 0, 1, 1], [], []>} : vector<8x32xf32>, vector<32x128xf32>, vector<8x128xf32> -> vector<8x128xf32>
    %14 = arith.addf %10, %13 : vector<8x128xf32>
    %c0_16 = arith.constant 0 : index
    %c0_17 = arith.constant 0 : index
    %c0_18 = arith.constant 0 : index
    %15 = vector.load %arg6[%c0_16, %c0_17, %c0_18] : memref<3x1x128xf32, #tpu.memory_space<vmem>>, vector<1x1x128xf32>
    %16 = vector.shape_cast %15 : vector<1x1x128xf32> to vector<1x128xf32>
    %17 = vector.broadcast %16 : vector<1x128xf32> to vector<8x128xf32>
    %18 = arith.addf %14, %17 : vector<8x128xf32>
    %19 = arith.negf %18 : vector<8x128xf32>
    %20 = math.exp %19 : vector<8x128xf32>
    %cst_19 = arith.constant 1.000000e+00 : f32
    %21 = vector.broadcast %cst_19 : f32 to vector<8x128xf32>
    %22 = arith.addf %21, %20 : vector<8x128xf32>
    %23 = arith.divf %21, %22 : vector<8x128xf32>
    %24 = math.tanh %18 : vector<8x128xf32>
    %25 = vector.extract_strided_slice %23 {offsets = [0, 0], sizes = [8, 32], strides = [1, 1]} : vector<8x128xf32> to vector<8x32xf32>
    %26 = vector.extract_strided_slice %23 {offsets = [0, 32], sizes = [8, 32], strides = [1, 1]} : vector<8x128xf32> to vector<8x32xf32>
    %27 = vector.extract_strided_slice %24 {offsets = [0, 64], sizes = [8, 32], strides = [1, 1]} : vector<8x128xf32> to vector<8x32xf32>
    %28 = vector.extract_strided_slice %23 {offsets = [0, 96], sizes = [8, 32], strides = [1, 1]} : vector<8x128xf32> to vector<8x32xf32>
    %29 = arith.mulf %26, %8 : vector<8x32xf32>
    %30 = arith.mulf %25, %27 : vector<8x32xf32>
    %31 = arith.addf %29, %30 : vector<8x32xf32>
    %32 = math.tanh %31 : vector<8x32xf32>
    %33 = arith.mulf %28, %32 : vector<8x32xf32>
    %c0_20 = arith.constant 0 : index
    %c0_21 = arith.constant 0 : index
    %c0_22 = arith.constant 0 : index
    %c0_23 = arith.constant 0 : index
    %34 = vector.load %arg11[%c0_20, %c0_21, %c0_22, %c0_23] : memref<2x3x8x32xf32, #tpu.memory_space<vmem>>, vector<1x1x8x32xf32>
    %35 = vector.shape_cast %34 : vector<1x1x8x32xf32> to vector<8x32xf32>
    %36 = vector.shape_cast %33 : vector<8x32xf32> to vector<1x1x8x32xf32>
    tpu.vector_store %arg11[%c0_20, %c0_21, %c0_22, %c0_23], %36 {strides = array<i32>} : memref<2x3x8x32xf32, #tpu.memory_space<vmem>>, vector<1x1x8x32xf32>,
    %c1_24 = arith.constant 1 : index
    %c0_25 = arith.constant 0 : index
    %c0_26 = arith.constant 0 : index
    %c0_27 = arith.constant 0 : index
    %37 = vector.load %arg11[%c1_24, %c0_25, %c0_26, %c0_27] : memref<2x3x8x32xf32, #tpu.memory_space<vmem>>, vector<1x1x8x32xf32>
    %38 = vector.shape_cast %37 : vector<1x1x8x32xf32> to vector<8x32xf32>
    %39 = vector.shape_cast %31 : vector<8x32xf32> to vector<1x1x8x32xf32>
    tpu.vector_store %arg11[%c1_24, %c0_25, %c0_26, %c0_27], %39 {strides = array<i32>} : memref<2x3x8x32xf32, #tpu.memory_space<vmem>>, vector<1x1x8x32xf32>,
    %c0_28 = arith.constant 0 : index
    %c1_29 = arith.constant 1 : index
    %c0_30 = arith.constant 0 : index
    %c0_31 = arith.constant 0 : index
    %40 = vector.load %arg11[%c0_28, %c1_29, %c0_30, %c0_31] : memref<2x3x8x32xf32, #tpu.memory_space<vmem>>, vector<1x1x8x32xf32>
    %41 = vector.shape_cast %40 : vector<1x1x8x32xf32> to vector<8x32xf32>
    %c1_32 = arith.constant 1 : index
    %c1_33 = arith.constant 1 : index
    %c0_34 = arith.constant 0 : index
    %c0_35 = arith.constant 0 : index
    %42 = vector.load %arg11[%c1_32, %c1_33, %c0_34, %c0_35] : memref<2x3x8x32xf32, #tpu.memory_space<vmem>>, vector<1x1x8x32xf32>
    %43 = vector.shape_cast %42 : vector<1x1x8x32xf32> to vector<8x32xf32>
    %c0_36 = arith.constant 0 : index
    %c0_37 = arith.constant 0 : index
    %c0_38 = arith.constant 0 : index
    %44 = vector.load %arg4[%c0_36, %c0_37, %c0_38] : memref<2x32x128xf32, #tpu.memory_space<vmem>>, vector<1x32x128xf32>
    %45 = vector.shape_cast %44 : vector<1x32x128xf32> to vector<32x128xf32>
    %cst_39 = arith.constant dense<0.000000e+00> : vector<8x128xf32>
    %46 = tpu.matmul %33, %45, %cst_39 {dimension_numbers = #tpu.dot_dimension_numbers<[1], [0], [0], [1], [0, 0, 1, 1], [], []>} : vector<8x32xf32>, vector<32x128xf32>, vector<8x128xf32> -> vector<8x128xf32>
    %c1_40 = arith.constant 1 : index
    %c0_41 = arith.constant 0 : index
    %c0_42 = arith.constant 0 : index
    %47 = vector.load %arg5[%c1_40, %c0_41, %c0_42] : memref<3x32x128xf32, #tpu.memory_space<vmem>>, vector<1x32x128xf32>
    %48 = vector.shape_cast %47 : vector<1x32x128xf32> to vector<32x128xf32>
    %cst_43 = arith.constant dense<0.000000e+00> : vector<8x128xf32>
    %49 = tpu.matmul %41, %48, %cst_43 {dimension_numbers = #tpu.dot_dimension_numbers<[1], [0], [0], [1], [0, 0, 1, 1], [], []>} : vector<8x32xf32>, vector<32x128xf32>, vector<8x128xf32> -> vector<8x128xf32>
    %50 = arith.addf %46, %49 : vector<8x128xf32>
    %c1_44 = arith.constant 1 : index
    %c0_45 = arith.constant 0 : index
    %c0_46 = arith.constant 0 : index
    %51 = vector.load %arg6[%c1_44, %c0_45, %c0_46] : memref<3x1x128xf32, #tpu.memory_space<vmem>>, vector<1x1x128xf32>
    %52 = vector.shape_cast %51 : vector<1x1x128xf32> to vector<1x128xf32>
    %53 = vector.broadcast %52 : vector<1x128xf32> to vector<8x128xf32>
    %54 = arith.addf %50, %53 : vector<8x128xf32>
    %55 = arith.negf %54 : vector<8x128xf32>
    %56 = math.exp %55 : vector<8x128xf32>
    %cst_47 = arith.constant 1.000000e+00 : f32
    %57 = vector.broadcast %cst_47 : f32 to vector<8x128xf32>
    %58 = arith.addf %57, %56 : vector<8x128xf32>
    %59 = arith.divf %57, %58 : vector<8x128xf32>
    %60 = math.tanh %54 : vector<8x128xf32>
    %61 = vector.extract_strided_slice %59 {offsets = [0, 0], sizes = [8, 32], strides = [1, 1]} : vector<8x128xf32> to vector<8x32xf32>
    %62 = vector.extract_strided_slice %59 {offsets = [0, 32], sizes = [8, 32], strides = [1, 1]} : vector<8x128xf32> to vector<8x32xf32>
    %63 = vector.extract_strided_slice %60 {offsets = [0, 64], sizes = [8, 32], strides = [1, 1]} : vector<8x128xf32> to vector<8x32xf32>
    %64 = vector.extract_strided_slice %59 {offsets = [0, 96], sizes = [8, 32], strides = [1, 1]} : vector<8x128xf32> to vector<8x32xf32>
    %65 = arith.mulf %62, %43 : vector<8x32xf32>
    %66 = arith.mulf %61, %63 : vector<8x32xf32>
    %67 = arith.addf %65, %66 : vector<8x32xf32>
    %68 = math.tanh %67 : vector<8x32xf32>
    %69 = arith.mulf %64, %68 : vector<8x32xf32>
    %c0_48 = arith.constant 0 : index
    %c1_49 = arith.constant 1 : index
    %c0_50 = arith.constant 0 : index
    %c0_51 = arith.constant 0 : index
    %70 = vector.load %arg11[%c0_48, %c1_49, %c0_50, %c0_51] : memref<2x3x8x32xf32, #tpu.memory_space<vmem>>, vector<1x1x8x32xf32>
    %71 = vector.shape_cast %70 : vector<1x1x8x32xf32> to vector<8x32xf32>
    %72 = vector.shape_cast %69 : vector<8x32xf32> to vector<1x1x8x32xf32>
    tpu.vector_store %arg11[%c0_48, %c1_49, %c0_50, %c0_51], %72 {strides = array<i32>} : memref<2x3x8x32xf32, #tpu.memory_space<vmem>>, vector<1x1x8x32xf32>,
    %c1_52 = arith.constant 1 : index
    %c1_53 = arith.constant 1 : index
    %c0_54 = arith.constant 0 : index
    %c0_55 = arith.constant 0 : index
    %73 = vector.load %arg11[%c1_52, %c1_53, %c0_54, %c0_55] : memref<2x3x8x32xf32, #tpu.memory_space<vmem>>, vector<1x1x8x32xf32>
    %74 = vector.shape_cast %73 : vector<1x1x8x32xf32> to vector<8x32xf32>
    %75 = vector.shape_cast %67 : vector<8x32xf32> to vector<1x1x8x32xf32>
    tpu.vector_store %arg11[%c1_52, %c1_53, %c0_54, %c0_55], %75 {strides = array<i32>} : memref<2x3x8x32xf32, #tpu.memory_space<vmem>>, vector<1x1x8x32xf32>,
    %c0_56 = arith.constant 0 : index
    %c2 = arith.constant 2 : index
    %c0_57 = arith.constant 0 : index
    %c0_58 = arith.constant 0 : index
    %76 = vector.load %arg11[%c0_56, %c2, %c0_57, %c0_58] : memref<2x3x8x32xf32, #tpu.memory_space<vmem>>, vector<1x1x8x32xf32>
    %77 = vector.shape_cast %76 : vector<1x1x8x32xf32> to vector<8x32xf32>
    %c1_59 = arith.constant 1 : index
    %c2_60 = arith.constant 2 : index
    %c0_61 = arith.constant 0 : index
    %c0_62 = arith.constant 0 : index
    %78 = vector.load %arg11[%c1_59, %c2_60, %c0_61, %c0_62] : memref<2x3x8x32xf32, #tpu.memory_space<vmem>>, vector<1x1x8x32xf32>
    %79 = vector.shape_cast %78 : vector<1x1x8x32xf32> to vector<8x32xf32>
    %c1_63 = arith.constant 1 : index
    %c0_64 = arith.constant 0 : index
    %c0_65 = arith.constant 0 : index
    %80 = vector.load %arg4[%c1_63, %c0_64, %c0_65] : memref<2x32x128xf32, #tpu.memory_space<vmem>>, vector<1x32x128xf32>
    %81 = vector.shape_cast %80 : vector<1x32x128xf32> to vector<32x128xf32>
    %cst_66 = arith.constant dense<0.000000e+00> : vector<8x128xf32>
    %82 = tpu.matmul %69, %81, %cst_66 {dimension_numbers = #tpu.dot_dimension_numbers<[1], [0], [0], [1], [0, 0, 1, 1], [], []>} : vector<8x32xf32>, vector<32x128xf32>, vector<8x128xf32> -> vector<8x128xf32>
    %c2_67 = arith.constant 2 : index
    %c0_68 = arith.constant 0 : index
    %c0_69 = arith.constant 0 : index
    %83 = vector.load %arg5[%c2_67, %c0_68, %c0_69] : memref<3x32x128xf32, #tpu.memory_space<vmem>>, vector<1x32x128xf32>
    %84 = vector.shape_cast %83 : vector<1x32x128xf32> to vector<32x128xf32>
    %cst_70 = arith.constant dense<0.000000e+00> : vector<8x128xf32>
    %85 = tpu.matmul %77, %84, %cst_70 {dimension_numbers = #tpu.dot_dimension_numbers<[1], [0], [0], [1], [0, 0, 1, 1], [], []>} : vector<8x32xf32>, vector<32x128xf32>, vector<8x128xf32> -> vector<8x128xf32>
    %86 = arith.addf %82, %85 : vector<8x128xf32>
    %c2_71 = arith.constant 2 : index
    %c0_72 = arith.constant 0 : index
    %c0_73 = arith.constant 0 : index
    %87 = vector.load %arg6[%c2_71, %c0_72, %c0_73] : memref<3x1x128xf32, #tpu.memory_space<vmem>>, vector<1x1x128xf32>
    %88 = vector.shape_cast %87 : vector<1x1x128xf32> to vector<1x128xf32>
    %89 = vector.broadcast %88 : vector<1x128xf32> to vector<8x128xf32>
    %90 = arith.addf %86, %89 : vector<8x128xf32>
    %91 = arith.negf %90 : vector<8x128xf32>
    %92 = math.exp %91 : vector<8x128xf32>
    %cst_74 = arith.constant 1.000000e+00 : f32
    %93 = vector.broadcast %cst_74 : f32 to vector<8x128xf32>
    %94 = arith.addf %93, %92 : vector<8x128xf32>
    %95 = arith.divf %93, %94 : vector<8x128xf32>
    %96 = math.tanh %90 : vector<8x128xf32>
    %97 = vector.extract_strided_slice %95 {offsets = [0, 0], sizes = [8, 32], strides = [1, 1]} : vector<8x128xf32> to vector<8x32xf32>
    %98 = vector.extract_strided_slice %95 {offsets = [0, 32], sizes = [8, 32], strides = [1, 1]} : vector<8x128xf32> to vector<8x32xf32>
    %99 = vector.extract_strided_slice %96 {offsets = [0, 64], sizes = [8, 32], strides = [1, 1]} : vector<8x128xf32> to vector<8x32xf32>
    %100 = vector.extract_strided_slice %95 {offsets = [0, 96], sizes = [8, 32], strides = [1, 1]} : vector<8x128xf32> to vector<8x32xf32>
    %101 = arith.mulf %98, %79 : vector<8x32xf32>
    %102 = arith.mulf %97, %99 : vector<8x32xf32>
    %103 = arith.addf %101, %102 : vector<8x32xf32>
    %104 = math.tanh %103 : vector<8x32xf32>
    %105 = arith.mulf %100, %104 : vector<8x32xf32>
    %c0_75 = arith.constant 0 : index
    %c2_76 = arith.constant 2 : index
    %c0_77 = arith.constant 0 : index
    %c0_78 = arith.constant 0 : index
    %106 = vector.load %arg11[%c0_75, %c2_76, %c0_77, %c0_78] : memref<2x3x8x32xf32, #tpu.memory_space<vmem>>, vector<1x1x8x32xf32>
    %107 = vector.shape_cast %106 : vector<1x1x8x32xf32> to vector<8x32xf32>
    %108 = vector.shape_cast %105 : vector<8x32xf32> to vector<1x1x8x32xf32>
    tpu.vector_store %arg11[%c0_75, %c2_76, %c0_77, %c0_78], %108 {strides = array<i32>} : memref<2x3x8x32xf32, #tpu.memory_space<vmem>>, vector<1x1x8x32xf32>,
    %c1_79 = arith.constant 1 : index
    %c2_80 = arith.constant 2 : index
    %c0_81 = arith.constant 0 : index
    %c0_82 = arith.constant 0 : index
    %109 = vector.load %arg11[%c1_79, %c2_80, %c0_81, %c0_82] : memref<2x3x8x32xf32, #tpu.memory_space<vmem>>, vector<1x1x8x32xf32>
    %110 = vector.shape_cast %109 : vector<1x1x8x32xf32> to vector<8x32xf32>
    %111 = vector.shape_cast %103 : vector<8x32xf32> to vector<1x1x8x32xf32>
    tpu.vector_store %arg11[%c1_79, %c2_80, %c0_81, %c0_82], %111 {strides = array<i32>} : memref<2x3x8x32xf32, #tpu.memory_space<vmem>>, vector<1x1x8x32xf32>,
    %c0_83 = arith.constant 0 : index
    %c0_84 = arith.constant 0 : index
    %112 = vector.load %arg7[%c0_83, %c0_84] : memref<32x128xf32, #tpu.memory_space<vmem>>, vector<32x128xf32>
    %cst_85 = arith.constant dense<0.000000e+00> : vector<8x128xf32>
    %113 = tpu.matmul %105, %112, %cst_85 {dimension_numbers = #tpu.dot_dimension_numbers<[1], [0], [0], [1], [0, 0, 1, 1], [], []>} : vector<8x32xf32>, vector<32x128xf32>, vector<8x128xf32> -> vector<8x128xf32>
    %c0_86 = arith.constant 0 : index
    %c0_87 = arith.constant 0 : index
    %114 = vector.load %arg8[%c0_86, %c0_87] : memref<1x128xf32, #tpu.memory_space<vmem>>, vector<1x128xf32>
    %115 = vector.broadcast %114 : vector<1x128xf32> to vector<8x128xf32>
    %116 = arith.addf %113, %115 : vector<8x128xf32>
    %117 = arith.negf %116 : vector<8x128xf32>
    %118 = math.exp %117 : vector<8x128xf32>
    %cst_88 = arith.constant 1.000000e+00 : f32
    %119 = vector.broadcast %cst_88 : f32 to vector<8x128xf32>
    %120 = arith.addf %119, %118 : vector<8x128xf32>
    %121 = arith.divf %119, %120 : vector<8x128xf32>
    %c0_89 = arith.constant 0 : index
    %c0_90 = arith.constant 0 : index
    %c0_91 = arith.constant 0 : index
    %122 = vector.load %arg9[%c0_89, %c0_90, %c0_91] : memref<1x8x128xf32, #tpu.memory_space<vmem>>, vector<1x8x128xf32>
    %123 = vector.shape_cast %122 : vector<1x8x128xf32> to vector<8x128xf32>
    %124 = vector.shape_cast %121 : vector<8x128xf32> to vector<1x8x128xf32>
    tpu.vector_store %arg9[%c0_89, %c0_90, %c0_91], %124 {strides = array<i32>} : memref<1x8x128xf32, #tpu.memory_space<vmem>>, vector<1x8x128xf32>,
    %c0_i32_92 = arith.constant 0 : i32
    %125 = arith.cmpi eq, %arg0, %c0_i32_92 : i32
    %126 = arith.extui %125 : i1 to i32
    %c0_i32_93 = arith.constant 0 : i32
    %127 = arith.cmpi ne, %126, %c0_i32_93 : i32
    scf.if %127 {
      %c0_94 = arith.constant 0 : index
      %c0_95 = arith.constant 0 : index
      %c0_96 = arith.constant 0 : index
      %c0_97 = arith.constant 0 : index
      %128 = vector.load %arg11[%c0_94, %c0_95, %c0_96, %c0_97] : memref<2x3x8x32xf32, #tpu.memory_space<vmem>>, vector<2x3x8x32xf32>
      %c0_98 = arith.constant 0 : index
      %c0_99 = arith.constant 0 : index
      %c0_100 = arith.constant 0 : index
      %c0_101 = arith.constant 0 : index
      %129 = vector.load %arg10[%c0_98, %c0_99, %c0_100, %c0_101] : memref<2x3x8x32xf32, #tpu.memory_space<vmem>>, vector<2x3x8x32xf32>
      tpu.vector_store %arg10[%c0_98, %c0_99, %c0_100, %c0_101], %128 {strides = array<i32>} : memref<2x3x8x32xf32, #tpu.memory_space<vmem>>, vector<2x3x8x32xf32>,
    } else {
    }
    return
  }
  func.func @transform_0(%arg0: i32) -> (i32, i32, i32) {
    %c0_i32 = arith.constant 0 : i32
    %c0_i32_0 = arith.constant 0 : i32
    %c0_i32_1 = arith.constant 0 : i32
    return %arg0, %c0_i32, %c0_i32_0 : i32, i32, i32
  }
  func.func @transform_1(%arg0: i32) -> (i32, i32, i32, i32) {
    %c0_i32 = arith.constant 0 : i32
    %c0_i32_0 = arith.constant 0 : i32
    %c0_i32_1 = arith.constant 0 : i32
    %c0_i32_2 = arith.constant 0 : i32
    %c0_i32_3 = arith.constant 0 : i32
    return %c0_i32, %c0_i32_0, %c0_i32_1, %c0_i32_2 : i32, i32, i32, i32
  }
  func.func @transform_2(%arg0: i32) -> (i32, i32) {
    %c0_i32 = arith.constant 0 : i32
    %c0_i32_0 = arith.constant 0 : i32
    %c0_i32_1 = arith.constant 0 : i32
    return %c0_i32, %c0_i32_0 : i32, i32
  }
  func.func @transform_3(%arg0: i32) -> (i32, i32, i32) {
    %c0_i32 = arith.constant 0 : i32
    %c0_i32_0 = arith.constant 0 : i32
    %c0_i32_1 = arith.constant 0 : i32
    %c0_i32_2 = arith.constant 0 : i32
    return %c0_i32, %c0_i32_0, %c0_i32_1 : i32, i32, i32
  }
  func.func @transform_4(%arg0: i32) -> (i32, i32, i32) {
    %c0_i32 = arith.constant 0 : i32
    %c0_i32_0 = arith.constant 0 : i32
    %c0_i32_1 = arith.constant 0 : i32
    %c0_i32_2 = arith.constant 0 : i32
    return %c0_i32, %c0_i32_0, %c0_i32_1 : i32, i32, i32
  }
  func.func @transform_5(%arg0: i32) -> (i32, i32, i32) {
    %c0_i32 = arith.constant 0 : i32
    %c0_i32_0 = arith.constant 0 : i32
    %c0_i32_1 = arith.constant 0 : i32
    %c0_i32_2 = arith.constant 0 : i32
    return %c0_i32, %c0_i32_0, %c0_i32_1 : i32, i32, i32
  }
  func.func @transform_6(%arg0: i32) -> (i32, i32) {
    %c0_i32 = arith.constant 0 : i32
    %c0_i32_0 = arith.constant 0 : i32
    %c0_i32_1 = arith.constant 0 : i32
    return %c0_i32, %c0_i32_0 : i32, i32
  }
  func.func @transform_7(%arg0: i32) -> (i32, i32) {
    %c0_i32 = arith.constant 0 : i32
    %c0_i32_0 = arith.constant 0 : i32
    %c0_i32_1 = arith.constant 0 : i32
    return %c0_i32, %c0_i32_0 : i32, i32
  }
  func.func @transform_8(%arg0: i32) -> (i32, i32, i32) {
    %c0_i32 = arith.constant 0 : i32
    %c0_i32_0 = arith.constant 0 : i32
    %c0_i32_1 = arith.constant 0 : i32
    return %arg0, %c0_i32, %c0_i32_0 : i32, i32, i32
  }
  func.func @transform_9(%arg0: i32) -> (i32, i32, i32, i32) {
    %c0_i32 = arith.constant 0 : i32
    %c0_i32_0 = arith.constant 0 : i32
    %c0_i32_1 = arith.constant 0 : i32
    %c0_i32_2 = arith.constant 0 : i32
    %c0_i32_3 = arith.constant 0 : i32
    return %c0_i32, %c0_i32_0, %c0_i32_1, %c0_i32_2 : i32, i32, i32, i32
  }
}

</mosaic_0001>

<bundles_post_ra>
// kernel: _fused_sequence.1
= control target key start
LH: loop header
LB: loop body
LE: loop exit
PB: predicated region body
PF: predicated region fallthrough
CT: control target
= control target key end

     0   :  { %15 = vsyncpa [#allocation4], 0  ;;  %s1055_s0 = inlined_call_operand.hbm [shape: f32[1,8,9], index: 0, kind: input, shape index: {}]   ;;  %s1056_s1 = inlined_call_operand.hbm [shape: f32[2,3,8,32], index: 1, kind: input, shape index: {}, may-alias: {1,9}]   ;;  %s1057_s2 = inlined_call_operand.hbm [shape: f32[9,128], index: 2, kind: input, shape index: {}]   ;;  %s1058_s3 = inlined_call_operand.hbm [shape: f32[2,32,128], index: 3, kind: input, shape index: {}]   ;;  %s1059_s4 = inlined_call_operand.vmem [shape: f32[3,32,128], index: 4, kind: input, shape index: {}]   ;;  %s1060_s5 = inlined_call_operand.hbm [shape: f32[3,1,128], index: 5, kind: input, shape index: {}]   ;;  %s1061_s6 = inlined_call_operand.hbm [shape: f32[32,128], index: 6, kind: input, shape index: {}]   ;;  %s1062_s7 = inlined_call_operand.vmem [shape: f32[1,128], index: 7, kind: input, shape index: {}]   ;;  %s1063_s8 = inlined_call_operand.hbm [shape: f32[1,8,128], index: 8, kind: output, shape index: {0}]   ;;  %s1064_s9 = inlined_call_operand.hbm [shape: f32[2,3,8,32], index: 9, kind: output, shape index: {1}, may-alias: {1,9}]  }
   0x1   :  { %16 = vsyncpa [#allocation7], 0 }
   0x2   :  { %17 = vsyncpa [#allocation10], 0 }
   0x3   :  { %18 = vsyncpa [#allocation13], 0 }
   0x4   :  { %19 = vsyncpa [#allocation5], 0  ;;  %s36_s11 = sshll.u32 %s1056_s1, 4  ;;  %s37_s11 = int_to_ptr.hbm [resolvable:$true] %s36_s11 }
   0x5   :  { %20 = vsyncpa [#allocation16], 0  ;;  %s865_s12 = smov [#allocation6]   ;;  %s62_s16 = sshll.u32 %s1058_s3, 4  ;;  %s63_s16 = int_to_ptr.hbm [resolvable:$true] %s62_s16 }
   0x6   :  { %s38_s13 = sshll.u32 %s865_s12, 4  ;;  %s866_s17 = smov 128   ;;  %s39_s13 = int_to_ptr.vmem [resolvable:$true] %s38_s13 }
   0x7   :  { %s867_s18 = smov 8   ;;  %s868_s19 = smov [#allocation9]  }
   0x8   :  { %44 = dma.hbm_to_vmem [thread:$0]  %s37_s11, 768, %s39_s13, [#allocation7], %s866_s17, %s866_s17, %s867_s18  }
   0x9   :  { %s64_s20 = sshll.u32 %s868_s19, 4  ;;  %s26_s22 = sshll.u32 %s1055_s0, 4  ;;  %s65_s20 = int_to_ptr.vmem [resolvable:$true] %s64_s20  ;;  %s27_s22 = int_to_ptr.hbm [resolvable:$true] %s26_s22 }
   0xa   :  { %70 = dma.hbm_to_vmem [thread:$0]  %s63_s16, 1024, %s65_s20, [#allocation10], %s866_s17, %s866_s17, %s867_s18  }
   0xb   :  { %s49_s24 = sshll.u32 %s1057_s2, 4  ;;  %s869_s25 = smov [#allocation3]   ;;  %s50_s24 = int_to_ptr.hbm [resolvable:$true] %s49_s24 }
   0xc   :  { %s28_s26 = sshll.u32 %s869_s25, 4  ;;  %s870_s27 = smov [#allocation8]   ;;  %s29_s26 = int_to_ptr.vmem [resolvable:$true] %s28_s26 }
   0xd   :  { %31 = dma.hbm_to_vmem [thread:$0]  %s27_s22, 128, %s29_s26, [#allocation4]  }
   0xe   :  { %s51_s28 = sshll.u32 %s870_s27, 4  ;;  %s77_s0 = sshll.u32 %s1060_s5, 4  ;;  %s52_s28 = int_to_ptr.vmem [resolvable:$true] %s51_s28  ;;  %s78_s0 = int_to_ptr.hbm [resolvable:$true] %s77_s0 }
   0xf   :  { %57 = dma.hbm_to_vmem [thread:$0]  %s50_s24, 256, %s52_s28, [#allocation7], %s866_s17, %s866_s17, %s867_s18  }
  0x10   :  { %s871_s10 = smov [#allocation11]   ;;  %s90_s13 = sshll.u32 %s1061_s6, 4  ;;  %s91_s13 = int_to_ptr.hbm [resolvable:$true] %s90_s13 }
  0x11   :  { %s79_s11 = sshll.u32 %s871_s10, 4  ;;  %s872_s14 = smov 16   ;;  %s80_s11 = int_to_ptr.vmem [resolvable:$true] %s79_s11 }
  0x12   :  { %s873_s15 = smov 1   ;;  %s874_s16 = smov [#allocation12]  }
  0x13   :  { %85 = dma.hbm_to_vmem [thread:$0]  %s78_s0, 48, %s80_s11, [#allocation10], %s872_s14, %s872_s14, %s873_s15  }
  0x14   :  { %s92_s19 = sshll.u32 %s874_s16, 4  ;;  %s93_s19 = int_to_ptr.vmem [resolvable:$true] %s92_s19 }
  0x15   :  { %98 = dma.hbm_to_vmem [thread:$0]  %s91_s13, 512, %s93_s19, [#allocation13], %s866_s17, %s866_s17, %s867_s18  }
  0x16   :  { %853 = dma.done.wait [#allocation4], 128  }
  0x17   :  { %854 = vsyncadd [#allocation4], 4294967168 }
  0x18   :  { %855 = dma.done.wait [#allocation7], 1024  }
  0x19   :  { %856 = vsyncadd [#allocation7], 4294966272 }
  0x1a   :  { %857 = dma.done.wait [#allocation10], 1072  }
  0x1b   :  { %858 = vsyncadd [#allocation10], 4294966224 }
  0x1c   :  { %859 = dma.done.wait [#allocation13], 512  }
  0x1d   :  { %860 = vsyncadd [#allocation13], 4294966784  ;;  %vm180_vm0 = vcmask 1040384   ;;  %v151_v0 = vld [vmem:[%s1059_s4 + $0x18] sm:$0xff]  ;;  %v150_v1 = vld [vmem:[%s1059_s4 + $0x10] sm:$0xff]  ;;  %vm135_vm1 = vcmask 261120  }
  0x1e   :  { %168 = vmatpush.msra.mxu0 %v151_v0  ;;  %v149_v2 = vld [vmem:[%s1059_s4 + $0x8] sm:$0xff]  ;;  %v147_v3 = vld [vmem:[#allocation8 + $0x8] sm:$0x1]  ;;  %v129_v5 = vld [vmem:[#allocation6] sm:$0xff]  ;;  %vm176_vm2 = vcmask 72704   ;;  %s875_s24 = smov 64  }
  0x1f   :  { %v146_v4 = vld [vmem:[#allocation8] sm:$0xff]  ;;  %595 = vmatpush.msk.msra.mxu1 %vm180_vm0, %v147_v3  ;;  %v142_v6 = vld [vmem:[#allocation3] sm:$0xff]  ;;  %136 = vst.msk [vmem:[#allocation2] sm:$0xff] %vm135_vm1, %v129_v5  ;;  %v148_v7 = vld [vmem:[%s1059_s4] sm:$0xff]  ;;  %s876_s25 = smov 32   ;;  %s573_s21 = sshll.u32 %s1064_s9, 4  ;;  %s574_s21 = int_to_ptr.hbm [resolvable:$true] %s573_s21 }
  0x20   :  { %169 = vmatpush.msra.mxu0 %v150_v1  ;;  %v132_v9 = vld [vmem:[#allocation6 + $0x18] sm:$0xff]  ;;  %v629_v11 = vld [vmem:[#allocation11] ss:$0 sm:$0xff]  ;;  %v266_v40 = vld [vmem:[#allocation9 + $0x10] sm:$0xff]  ;;  %s878_s1 = smov [#allocation15]   ;;  %s879_s9 = smov [#allocation14]  }
  0x21   :  { %199 = vmatpush.msra.mxu1 %v146_v4  ;;  %139 = vst.msk [vmem:[#allocation2 + $0x18] sm:$0xff] %vm135_vm1, %v132_v9  ;;  %v601_v37 = vld [vmem:[%s1059_s4 + $0x38] sm:$0xff]  ;;  %v267_v38 = vld [vmem:[#allocation9 + $0x18] sm:$0xff]  ;;  %v599_v41 = vld [vmem:[%s1059_s4 + $0x28] sm:$0xff]  ;;  %s571_s22 = sshll.u32 %s878_s1, 4  ;;  %s572_s22 = int_to_ptr.vmem [resolvable:$true] %s571_s22 }
  0x22   :  { %170 = vmatpush.msra.mxu0 %v149_v2  ;;  %596 = vmatmul.msk.f32.vlgmr.msra.gmra.mxu1 %vm176_vm2, %v142_v6  ;;  %v600_v39 = vld [vmem:[%s1059_s4 + $0x30] sm:$0xff]  ;;  %v265_v42 = vld [vmem:[#allocation9 + $0x8] sm:$0xff]  ;;  %v264_v44 = vld [vmem:[#allocation9] sm:$0xff] }
  0x23   :  { %288 = vmatpush.msra.mxu2 %v601_v37  ;;  %310 = vmatpush.msra.mxu3 %v267_v38  ;;  %v598_v43 = vld [vmem:[%s1059_s4 + $0x20] sm:$0xff]  ;;  %v133_v49 = vld [vmem:[#allocation6 + $0x20] sm:$0xff] }
  0x24   :  { %171 = vmatpush.msra.mxu0 %v148_v7  ;;  %v130_v47 = vld [vmem:[#allocation6 + $0x8] sm:$0xff]  ;;  %140 = vst.msk [vmem:[#allocation2 + $0x20] sm:$0xff] %vm135_vm1, %v133_v49  ;;  %v630_v54 = vld [vmem:[#allocation11 + $0x1] ss:$0 sm:$0xff] }
  0x25   :  { %289 = vmatpush.msra.mxu2 %v600_v39  ;;  %311 = vmatpush.msra.mxu3 %v266_v40  ;;  %137 = vst.msk [vmem:[#allocation2 + $0x8] sm:$0xff] %vm135_vm1, %v130_v47 }
  0x26   :  { %v143_v8 = vld [vmem:[#allocation2] sm:$0xff] }
  0x27   :  { %594 = vmatmul.msk.f32.vlgmr.msra.gmra.mxu0 %vm135_vm1, %v143_v8  ;;  %290 = vmatpush.msra.mxu2 %v599_v41 }
  0x28   :  { %v145_v16 = vld [vmem:[#allocation2 + $0x18] sm:$0xff]  ;;  %312 = vmatpush.msra.mxu3 %v265_v42 }
  0x29   :  { %291 = vmatpush.msra.mxu2 %v598_v43 }
  0x2a   :  { %313 = vmatpush.msra.mxu3 %v264_v44 }
  0x2b   :  { %v263_v50 = vld [vmem:[#allocation2 + $0x20] sm:$0xff] }
  0x2c   :  { %v261_v48 = vld [vmem:[#allocation2 + $0x8] sm:$0xff] }
  0x2d   :  { %602 = vmatmul.msk.f32.vlgmr.msra.gmra.mxu2 %vm135_vm1, %v261_v48 }
  0x9f   :  { %v201_v10 = vpop.f32.mrf.mxu1 }
  0xa4   :  { %v173_v12 = vpop.f32.mrf.mxu0 }
  0xa5   :  { %v202_v13 = vadd.f32 %v201_v10, %v173_v12 }
  0xa7   :  { %v208_v14 = vadd.f32 %v629_v11, %v202_v13 }
  0xa9   :  { %633 = vtanh.f32 %v208_v14  ;;  %v597_v17 = vmul.f32 -1.442695, %v208_v14 }
  0xab   :  { %635 = vpow2.f32 %v597_v17  ;;  %v607_v17 = vld [vmem:[%s1059_s4 + $0x50] sm:$0xff] }
  0xaf   :  { %v634_v15 = vpop.eup %633 }
  0xb0   :  { %235 = vrot.lane.b32.xlu0 %v634_v15, %s875_s24  ;;  %v293_v53 = vpop.f32.mrf.mxu2  ;;  %v608_v15 = vld [vmem:[%s1059_s4 + $0x58] sm:$0xff] }
  0xb1   :  { %v636_v18 = vpop.eup %635  ;;  %404 = vmatpush.msrb.mxu1 %v608_v15 }
  0xb2   :  { %v212_v19 = vadd.f32 1.0, %v636_v18  ;;  %v382_v18 = vld [vmem:[#allocation9 + $0x30] sm:$0xff] }
  0xb3   :  { %405 = vmatpush.msrb.mxu1 %v607_v17 }
  0xb4   :  { %637 = vrcp.f32 %v212_v19  ;;  %v224_v25 = vand.u32 2147483648, %v212_v19  ;;  %vm218_vm4 = vweird.f32 %v212_v19  ;;  %v222_v26 = vand.u32 2147483647, %v212_v19 }
  0xb6   :  { %v225_v28 = vor.u32 1.1754944e-38, %v224_v25  ;;  %vm223_vm6 = vcmp.eq.f32.partialorder %v222_v26, 8.507059e+37  ;;  %v131_v25 = vld [vmem:[#allocation6 + $0x10] sm:$0xff] }
  0xb7   :  { %138 = vst.msk [vmem:[#allocation2 + $0x10] sm:$0xff] %vm135_vm1, %v131_v25 }
  0xb8   :  { %230 = vrot.lane.b32.xlu0 %v145_v16, %s876_s25  ;;  %v383_v16 = vld [vmem:[#allocation9 + $0x38] sm:$0xff] }
  0xb9   :  { %426 = vmatpush.msrb.mxu0 %v383_v16 }
  0xba   :  { %v638_v20 = vpop.eup %637 }
  0xbb   :  { %v214_v21 = vmul.f32 %v638_v20, %v212_v19  ;;  %vm219_vm3 = vweird.f32 %v638_v20  ;;  %v606_v19 = vld [vmem:[%s1059_s4 + $0x48] sm:$0xff]  ;;  %427 = vmatpush.msrb.mxu0 %v382_v18 }
  0xbc   :  { %vm220_vm5 = vmor %vm218_vm4, %vm219_vm3  ;;  %406 = vmatpush.msrb.mxu1 %v606_v19 }
  0xbd   :  { %v215_v22 = vsub.f32 1.0, %v214_v21  ;;  %v605_v21 = vld [vmem:[%s1059_s4 + $0x40] sm:$0xff]  ;;  %s877_s4 = smov 96  }
  0xbe   :  { %407 = vmatpush.msrb.mxu1 %v605_v21  ;;  %v376_v26 = vld [vmem:[#allocation2 + $0x10] sm:$0xff] }
  0xbf   :  { %v216_v23 = vmul.f32 %v638_v20, %v215_v22  ;;  %v380_v22 = vld [vmem:[#allocation9 + $0x20] sm:$0xff]  ;;  %609 = vmatmul.msk.f32.vlgmr.msrb.gmra.mxu1 %vm135_vm1, %v376_v26 }
  0xc0   :  { %345 = vrot.lane.b32.xlu0 %v263_v50, %s876_s25 }
  0xc1   :  { %v217_v24 = vadd.f32 %v638_v20, %v216_v23 }
  0xc3   :  { %v221_v27 = vsel %vm220_vm5, %v638_v20, %v217_v24  ;;  %v381_v20 = vld [vmem:[#allocation9 + $0x28] sm:$0xff] }
  0xc4   :  { %v226_v30 = vsel %vm223_vm6, %v225_v28, %v221_v27  ;;  %428 = vmatpush.msrb.mxu0 %v381_v20  ;;  %v134_v27 = vld [vmem:[#allocation6 + $0x28] sm:$0xff] }
  0xc5   :  { %141 = vst.msk [vmem:[#allocation2 + $0x28] sm:$0xff] %vm135_vm1, %v134_v27 }
  0xc6   :  { %429 = vmatpush.msrb.mxu0 %v380_v22 }
  0xcc   :  { %v378_v28 = vld [vmem:[#allocation2 + $0x28] sm:$0xff] }
 0x122   :  { %v236_v29 = vpop.permute.xlu0 %235 }
 0x123   :  { %v238_v31 = vmul.f32 %v236_v29, %v226_v30 }
 0x125   :  { %240 = vrot.lane.b32.xlu1 %v238_v31, %s876_s25 }
 0x12a   :  { %v231_v32 = vpop.permute.xlu0 %230 }
 0x12b   :  { %v233_v33 = vmul.f32 %v231_v32, %v226_v30  ;;  %v631_v32 = vld [vmem:[#allocation11 + $0x2] ss:$0 sm:$0xff] }
 0x132   :  { %v346_v10 = vpop.permute.xlu0 %345 }
 0x13c   :  { %v409_v31 = vpop.f32.mrf.mxu1 }
 0x197   :  { %v241_v34 = vpop.permute.xlu1 %240 }
 0x198   :  { %v978_v35 = vadd.f32 %v241_v34, %v233_v33 }
 0x19a   :  { %639 = vtanh.f32 %v978_v35 }
 0x1a0   :  { %v640_v36 = vpop.eup %639 }
 0x1a1   :  { %246 = vrot.lane.b32.xlu1 %v640_v36, %s875_s24 }
 0x213   :  { %v247_v45 = vpop.permute.xlu1 %246 }
 0x214   :  { %v249_v46 = vmul.f32 %v247_v45, %v226_v30 }
 0x216   :  { %251 = vrot.lane.b32.xlu2 %v249_v46, %s876_s25 }
 0x270   :  { %v252_v51 = vpop.permute.xlu2 %251 }
 0x271   :  { %254 = vst.msk [vmem:[#allocation2] sm:$0xff] %vm135_vm1, %v252_v51  ;;  %603 = vmatmul.msk.f32.vlgmr.msra.gmra.mxu3 %vm135_vm1, %v252_v51 }
 0x278   :  { %v544_v52 = vld [vmem:[#allocation2] sm:$0xff] }
 0x279   :  { %550 = vst.msk [vmem:[#allocation15] sm:$0xff] %vm135_vm1, %v544_v52 }
 0x2f4   :  { %v315_v55 = vpop.f32.mrf.mxu3 }
 0x2f5   :  { %v316_v56 = vadd.f32 %v315_v55, %v293_v53 }
 0x2f7   :  { %v323_v57 = vadd.f32 %v630_v54, %v316_v56 }
 0x2f9   :  { %641 = vtanh.f32 %v323_v57  ;;  %v604_v59 = vmul.f32 -1.442695, %v323_v57 }
 0x2fb   :  { %643 = vpow2.f32 %v604_v59 }
 0x2ff   :  { %v642_v58 = vpop.eup %641 }
 0x300   :  { %350 = vrot.lane.b32.xlu2 %v642_v58, %s875_s24 }
 0x301   :  { %v644_v60 = vpop.eup %643 }
 0x302   :  { %v327_v61 = vadd.f32 1.0, %v644_v60  ;;  %v494_v60 = vld [vmem:[#allocation12 + $0x18] sm:$0xff] }
 0x303   :  { %513 = vmatpush.msrb.mxu2 %v494_v60 }
 0x304   :  { %645 = vrcp.f32 %v327_v61  ;;  %v339_v3 = vand.u32 2147483648, %v327_v61  ;;  %vm333_vm8 = vweird.f32 %v327_v61  ;;  %v337_v4 = vand.u32 2147483647, %v327_v61 }
 0x306   :  { %v340_v6 = vor.u32 1.1754944e-38, %v339_v3  ;;  %vm338_vm10 = vcmp.eq.f32.partialorder %v337_v4, 8.507059e+37 }
 0x30a   :  { %v646_v62 = vpop.eup %645 }
 0x30b   :  { %v329_v63 = vmul.f32 %v646_v62, %v327_v61  ;;  %vm334_vm7 = vweird.f32 %v646_v62  ;;  %v493_v61 = vld [vmem:[#allocation12 + $0x10] sm:$0xff] }
 0x30c   :  { %vm335_vm9 = vmor %vm333_vm8, %vm334_vm7  ;;  %514 = vmatpush.msrb.mxu2 %v493_v61 }
 0x30d   :  { %v330_v0 = vsub.f32 1.0, %v329_v63 }
 0x30f   :  { %v331_v1 = vmul.f32 %v646_v62, %v330_v0 }
 0x311   :  { %v332_v2 = vadd.f32 %v646_v62, %v331_v1 }
 0x313   :  { %v336_v5 = vsel %vm335_vm9, %v646_v62, %v332_v2  ;;  %v491_v62 = vld [vmem:[#allocation12] sm:$0xff] }
 0x314   :  { %v341_v7 = vsel %vm338_vm10, %v340_v6, %v336_v5 }
 0x315   :  { %v348_v11 = vmul.f32 %v346_v10, %v341_v7 }
 0x35a   :  { %v351_v8 = vpop.permute.xlu2 %350 }
 0x35b   :  { %v353_v9 = vmul.f32 %v351_v8, %v341_v7 }
 0x35d   :  { %355 = vrot.lane.b32.xlu1 %v353_v9, %s876_s25 }
 0x3cf   :  { %v356_v12 = vpop.permute.xlu1 %355 }
 0x3d0   :  { %v1004_v13 = vadd.f32 %v356_v12, %v348_v11 }
 0x3d2   :  { %647 = vtanh.f32 %v1004_v13 }
 0x3d8   :  { %v648_v14 = vpop.eup %647 }
 0x3d9   :  { %361 = vrot.lane.b32.xlu2 %v648_v14, %s875_s24 }
 0x3e1   :  { %461 = vrot.lane.b32.xlu2 %v378_v28, %s876_s25 }
 0x433   :  { %v362_v23 = vpop.permute.xlu2 %361 }
 0x434   :  { %v364_v24 = vmul.f32 %v362_v23, %v341_v7  ;;  %v632_v7 = vld [vmem:[%s1062_s7] ss:$0 sm:$0xff]  ;;  %s563_s7 = sshll.u32 %s1063_s8, 4  ;;  %s564_s7 = int_to_ptr.hbm [resolvable:$true] %s563_s7 }
 0x436   :  { %366 = vrot.lane.b32.xlu0 %v364_v24, %s876_s25 }
 0x43b   :  { %v462_v53 = vpop.permute.xlu2 %461 }
 0x4a8   :  { %v367_v29 = vpop.permute.xlu0 %366 }
 0x4a9   :  { %369 = vst.msk [vmem:[#allocation2 + $0x8] sm:$0xff] %vm135_vm1, %v367_v29  ;;  %610 = vmatmul.msk.f32.vlgmr.msrb.gmra.mxu0 %vm135_vm1, %v367_v29 }
 0x4b0   :  { %v545_v30 = vld [vmem:[#allocation2 + $0x8] sm:$0xff] }
 0x4b1   :  { %551 = vst.msk [vmem:[#allocation15 + $0x8] sm:$0xff] %vm135_vm1, %v545_v30 }
 0x526   :  { %v431_v33 = vpop.f32.mrf.mxu0 }
 0x527   :  { %v432_v34 = vadd.f32 %v431_v33, %v409_v31 }
 0x529   :  { %v439_v36 = vadd.f32 %v631_v32, %v432_v34 }
 0x52b   :  { %649 = vtanh.f32 %v439_v36  ;;  %v611_v38 = vmul.f32 -1.442695, %v439_v36 }
 0x52d   :  { %651 = vpow2.f32 %v611_v38 }
 0x531   :  { %v650_v37 = vpop.eup %649 }
 0x532   :  { %466 = vrot.lane.b32.xlu1 %v650_v37, %s875_s24 }
 0x533   :  { %v652_v39 = vpop.eup %651 }
 0x534   :  { %v443_v40 = vadd.f32 1.0, %v652_v39 }
 0x536   :  { %653 = vrcp.f32 %v443_v40  ;;  %v455_v46 = vand.u32 2147483648, %v443_v40  ;;  %vm449_vm12 = vweird.f32 %v443_v40  ;;  %v453_v47 = vand.u32 2147483647, %v443_v40 }
 0x538   :  { %v456_v49 = vor.u32 1.1754944e-38, %v455_v46  ;;  %vm454_vm14 = vcmp.eq.f32.partialorder %v453_v47, 8.507059e+37 }
 0x53c   :  { %v654_v41 = vpop.eup %653 }
 0x53d   :  { %v445_v42 = vmul.f32 %v654_v41, %v443_v40  ;;  %vm450_vm11 = vweird.f32 %v654_v41 }
 0x53e   :  { %vm451_vm13 = vmor %vm449_vm12, %vm450_vm11 }
 0x53f   :  { %v446_v43 = vsub.f32 1.0, %v445_v42 }
 0x541   :  { %v447_v44 = vmul.f32 %v654_v41, %v446_v43 }
 0x543   :  { %v448_v45 = vadd.f32 %v654_v41, %v447_v44 }
 0x545   :  { %v452_v48 = vsel %vm451_vm13, %v654_v41, %v448_v45 }
 0x546   :  { %v457_v50 = vsel %vm454_vm14, %v456_v49, %v452_v48 }
 0x547   :  { %v464_v54 = vmul.f32 %v462_v53, %v457_v50 }
 0x5a4   :  { %v467_v51 = vpop.permute.xlu1 %466 }
 0x5a5   :  { %v469_v52 = vmul.f32 %v467_v51, %v457_v50 }
 0x5a7   :  { %471 = vrot.lane.b32.xlu0 %v469_v52, %s876_s25 }
 0x5af   :  { %256 = vrot.lane.b32.xlu0 %v978_v35, %s877_s4  ;;  %v492_v35 = vld [vmem:[#allocation12 + $0x8] sm:$0xff] }
 0x5b0   :  { %515 = vmatpush.msrb.mxu2 %v492_v35 }
 0x5b2   :  { %516 = vmatpush.msrb.mxu2 %v491_v62 }
 0x619   :  { %v472_v55 = vpop.permute.xlu0 %471 }
 0x61a   :  { %v474_v56 = vadd.f32 %v472_v55, %v464_v54 }
 0x61c   :  { %655 = vtanh.f32 %v474_v56 }
 0x621   :  { %v257_v57 = vpop.permute.xlu0 %256 }
 0x622   :  { %v656_v58 = vpop.eup %655  ;;  %259 = vst.msk [vmem:[#allocation2 + $0x18] sm:$0xff] %vm135_vm1, %v257_v57 }
 0x623   :  { %477 = vrot.lane.b32.xlu1 %v656_v58, %s875_s24 }
 0x629   :  { %v547_v59 = vld [vmem:[#allocation2 + $0x18] sm:$0xff] }
 0x62a   :  { %553 = vst.msk [vmem:[#allocation15 + $0x18] sm:$0xff] %vm135_vm1, %v547_v59 }
 0x62b   :  { %371 = vrot.lane.b32.xlu1 %v1004_v13, %s877_s4 }
 0x695   :  { %v478_v63 = vpop.permute.xlu1 %477 }
 0x696   :  { %v480_v0 = vmul.f32 %v478_v63, %v457_v50 }
 0x698   :  { %482 = vrot.lane.b32.xlu2 %v480_v0, %s876_s25 }
 0x69d   :  { %v372_v1 = vpop.permute.xlu1 %371 }
 0x69e   :  { %374 = vst.msk [vmem:[#allocation2 + $0x20] sm:$0xff] %vm135_vm1, %v372_v1 }
 0x6a0   :  { %487 = vrot.lane.b32.xlu2 %v474_v56, %s877_s4 }
 0x6a5   :  { %v548_v2 = vld [vmem:[#allocation2 + $0x20] sm:$0xff] }
 0x6a6   :  { %554 = vst.msk [vmem:[#allocation15 + $0x20] sm:$0xff] %vm135_vm1, %v548_v2 }
 0x6f2   :  { %v483_v3 = vpop.permute.xlu2 %482 }
 0x6f3   :  { %485 = vst.msk [vmem:[#allocation2 + $0x10] sm:$0xff] %vm135_vm1, %v483_v3  ;;  %612 = vmatmul.msk.f32.vlgmr.msrb.gmra.mxu2 %vm135_vm1, %v483_v3 }
 0x6fa   :  { %v488_v4 = vpop.permute.xlu2 %487  ;;  %v546_v5 = vld [vmem:[#allocation2 + $0x10] sm:$0xff] }
 0x6fb   :  { %490 = vst.msk [vmem:[#allocation2 + $0x28] sm:$0xff] %vm135_vm1, %v488_v4 }
 0x6fc   :  { %552 = vst.msk [vmem:[#allocation15 + $0x10] sm:$0xff] %vm135_vm1, %v546_v5 }
 0x702   :  { %v549_v6 = vld [vmem:[#allocation2 + $0x28] sm:$0xff] }
 0x703   :  { %555 = vst.msk [vmem:[#allocation15 + $0x28] sm:$0xff] %vm135_vm1, %v549_v6 }
 0x704   :  { %579 = dma.vmem_to_hbm [thread:$0]  %s572_s22, 768, %s574_s21, [#allocation16], %s866_s17, %s866_s17, %s867_s18  }
 0x705   :  { %s561_s17 = sshll.u32 %s879_s9, 4  ;;  %s562_s17 = int_to_ptr.vmem [resolvable:$true] %s561_s17 }
 0x776   :  { %v518_v8 = vpop.f32.mrf.mxu2 }
 0x777   :  { %v519_v9 = vadd.f32 %v632_v7, %v518_v8 }
 0x779   :  { %v613_v10 = vmul.f32 -1.442695, %v519_v9 }
 0x77b   :  { %657 = vpow2.f32 %v613_v10 }
 0x781   :  { %v658_v11 = vpop.eup %657 }
 0x782   :  { %v524_v12 = vadd.f32 1.0, %v658_v11 }
 0x784   :  { %659 = vrcp.f32 %v524_v12  ;;  %v536_v16 = vand.u32 2147483648, %v524_v12  ;;  %v534_v18 = vand.u32 2147483647, %v524_v12  ;;  %vm530_vm0 = vweird.f32 %v524_v12 }
 0x786   :  { %v537_v20 = vor.u32 1.1754944e-38, %v536_v16  ;;  %vm535_vm2 = vcmp.eq.f32.partialorder %v534_v18, 8.507059e+37 }
 0x78a   :  { %v660_v13 = vpop.eup %659 }
 0x78b   :  { %v526_v14 = vmul.f32 %v660_v13, %v524_v12  ;;  %vm531_vm15 = vweird.f32 %v660_v13 }
 0x78c   :  { %vm532_vm1 = vmor %vm530_vm0, %vm531_vm15 }
 0x78d   :  { %v527_v15 = vsub.f32 1.0, %v526_v14 }
 0x78f   :  { %v528_v17 = vmul.f32 %v660_v13, %v527_v15 }
 0x791   :  { %v529_v19 = vadd.f32 %v660_v13, %v528_v17 }
 0x793   :  { %v533_v21 = vsel %vm532_vm1, %v660_v13, %v529_v19 }
 0x794   :  { %v538_v22 = vsel %vm535_vm2, %v537_v20, %v533_v21 }
 0x795   :  { %540 = vst [vmem:[#allocation14] sm:$0xff] %v538_v22 }
 0x796   :  { %566 = dma.vmem_to_hbm [thread:$0]  %s562_s17, 128, %s564_s7, [#allocation5]  }
 0x797   :  { %861 = dma.done.wait [#allocation5], 128  }
 0x798   :  { %862 = vsyncadd [#allocation5], 4294967168 }
 0x799   :  { %863 = dma.done.wait [#allocation16], 768  }
 0x79a   :  { %864 = vsyncadd [#allocation16], 4294966528 }
 0x79b   :  { %588 = vsyncpa [#allocation4], 1 }
 0x79c   :  { %589 = vsyncpa [#allocation7], 1 }
 0x79d   :  { %590 = vsyncpa [#allocation10], 1 }
 0x79e   :  { %591 = vsyncpa [#allocation13], 1 }
 0x79f   :  { %592 = vsyncpa [#allocation5], 1 }
 0x7a0   :  { %593 = vsyncpa [#allocation16], 1 }

</bundles_post_ra>
